<compile_context>
chip_gen: v7x
topology: tpu7x:2x2x1
jax: 0.10.0
libtpu: 0.0.40
codegen_flags: <defaults>
</compile_context>

<pallas_src>
import functools

import jax
import jax.numpy as jnp
import numpy as np
from jax import lax
from jax.experimental import pallas as pl
from jax.experimental.pallas import tpu as pltpu

NEG_INF = -1e30
VMEM_LIMIT_BYTES = 32 * 1024 * 1024   # >= v5e default, == v6e/v7x default; safe everywhere


def _pick_tile(dim, cap, align):
    """Largest t <= cap with dim % t == 0 and t % align == 0, else the full dim."""
    cap = min(dim, cap)
    if cap == dim:
        return dim
    for t in range(cap, 0, -1):
        if dim % t == 0 and t % align == 0:
            return t
    return dim


def _rotate_half(x):
    half = x.shape[-1] // 2
    return jnp.concatenate([-x[..., half:], x[..., :half]], axis=-1)


# ---------------------------------------------------------------------------
# Kernel 1: head-major projection    out[h, s, :] = x[s, :] @ w[h, :, :]
# ---------------------------------------------------------------------------
def _head_proj_kernel(x_ref, w_ref, o_ref, acc_ref):
    @pl.when(pl.program_id(2) == 0)
    def _init():
        acc_ref[...] = jnp.zeros_like(acc_ref)

    acc_ref[...] += jnp.dot(x_ref[...], w_ref[0],
                            preferred_element_type=jnp.float32)

    @pl.when(pl.program_id(2) == pl.num_programs(2) - 1)
    def _store():
        o_ref[0] = acc_ref[...].astype(o_ref.dtype)


def head_major_projection(x, w_hm, *, m_block, k_block, out_dtype=jnp.bfloat16):
    S, K = x.shape
    H, K2, hd = w_hm.shape
    assert K == K2
    tm = _pick_tile(S, m_block, 8)
    tk = _pick_tile(K, k_block, 128)
    grid = (H, S // tm, K // tk)
    flops = 2 * S * K * H * hd
    bytes_accessed = (S * K + H * K * hd + H * S * hd) * 2
    return pl.pallas_call(
        _head_proj_kernel,
        out_shape=jax.ShapeDtypeStruct((H, S, hd), out_dtype),
        grid_spec=pltpu.PrefetchScalarGridSpec(
            num_scalar_prefetch=0,
            grid=grid,
            in_specs=[
                pl.BlockSpec((tm, tk), lambda h, i, k: (i, k)),
                pl.BlockSpec((1, tk, hd), lambda h, i, k: (h, k, 0)),
            ],
            out_specs=pl.BlockSpec((1, tm, hd), lambda h, i, k: (h, i, 0)),
            scratch_shapes=[pltpu.VMEM((tm, hd), jnp.float32)],
        ),
        compiler_params=pltpu.CompilerParams(
            dimension_semantics=("parallel", "parallel", "arbitrary"),
            vmem_limit_bytes=VMEM_LIMIT_BYTES,
        ),
        cost_estimate=pl.CostEstimate(flops=flops, transcendentals=0,
                                      bytes_accessed=bytes_accessed),
    )(x, w_hm)


# ---------------------------------------------------------------------------
# Kernel 2: flash attention with fused neox-RoPE, causal tile skip, GQA.
# ---------------------------------------------------------------------------
def _flash_attn_kernel(q_ref, k_ref, v_ref, cq_ref, sq_ref, ck_ref, sk_ref,
                       o_ref, q_scr, m_scr, l_scr, acc_scr,
                       *, scale, tq, tkv, group):
    qi = pl.program_id(1)
    ki = pl.program_id(2)
    nk = pl.num_programs(2)
    hd = q_ref.shape[-1]

    @pl.when(ki == 0)
    def _init():
        # RoPE + softmax scale folded into q once per q tile, cached in VMEM.
        q = q_ref[...].astype(jnp.float32)                       # [group, tq, hd]
        cos = cq_ref[...][None, :, :]
        sin = sq_ref[...][None, :, :]
        q = (q * cos + _rotate_half(q) * sin) * scale
        q_scr[...] = q.reshape(group * tq, hd).astype(q_scr.dtype)
        m_scr[...] = jnp.full_like(m_scr, NEG_INF)
        l_scr[...] = jnp.zeros_like(l_scr)
        acc_scr[...] = jnp.zeros_like(acc_scr)

    # Skip KV tiles that lie entirely in the causal-masked future.
    @pl.when(ki * tkv <= qi * tq + (tq - 1))
    def _update():
        k = k_ref[0].astype(jnp.float32)                         # [tkv, hd]
        k = k * ck_ref[...] + _rotate_half(k) * sk_ref[...]
        k = k.astype(q_scr.dtype)
        v = v_ref[0]                                             # [tkv, hd]
        q = q_scr[...]                                           # [group*tq, hd]

        # Contract head_dim without materializing k.T.
        s = lax.dot_general(q, k, (((1,), (1,)), ((), ())),
                            preferred_element_type=jnp.float32)  # [G, tkv]

        r = lax.broadcasted_iota(jnp.int32, s.shape, 0)
        c = lax.broadcasted_iota(jnp.int32, s.shape, 1)
        q_pos = qi * tq + (r % tq)
        k_pos = ki * tkv + c
        s = jnp.where(k_pos <= q_pos, s, NEG_INF)

        m_prev = m_scr[...]
        m_new = jnp.maximum(m_prev, jnp.max(s, axis=-1, keepdims=True))
        alpha = jnp.exp(m_prev - m_new)
        p = jnp.exp(s - m_new)
        l_scr[...] = alpha * l_scr[...] + jnp.sum(p, axis=-1, keepdims=True)
        acc_scr[...] = alpha * acc_scr[...] + lax.dot_general(
            p.astype(v.dtype), v, (((1,), (0,)), ((), ())),
            preferred_element_type=jnp.float32)
        m_scr[...] = m_new

    @pl.when(ki == nk - 1)
    def _finalize():
        out = acc_scr[...] * pl.reciprocal(l_scr[...], approx=True)
        o_ref[...] = out.reshape(group, tq, hd).astype(o_ref.dtype)


def flash_attention(qkv_hm, cos, sin, num_heads, num_kv_heads, scale,
                    *, q_block, kv_block):
    H, S, hd = qkv_hm.shape
    assert H == num_heads + 2 * num_kv_heads
    group = num_heads // num_kv_heads
    tq = _pick_tile(S, q_block, 8)
    tkv = _pick_tile(S, kv_block, 8)
    grid = (num_kv_heads, S // tq, S // tkv)
    kernel = functools.partial(_flash_attn_kernel, scale=scale,
                               tq=tq, tkv=tkv, group=group)
    flops = 4 * num_heads * S * S * hd
    bytes_accessed = (2 * H + num_heads) * S * hd * 2
    return pl.pallas_call(
        kernel,
        out_shape=jax.ShapeDtypeStruct((num_heads, S, hd), jnp.bfloat16),
        grid_spec=pltpu.PrefetchScalarGridSpec(
            num_scalar_prefetch=0,
            grid=grid,
            in_specs=[
                # whole GQA group of q heads for this kv head
                pl.BlockSpec((group, tq, hd), lambda h, qi, ki: (h, qi, 0)),
                # k head
                pl.BlockSpec((1, tkv, hd),
                             lambda h, qi, ki: (num_heads + h, ki, 0)),
                # v head
                pl.BlockSpec((1, tkv, hd),
                             lambda h, qi, ki: (num_heads + num_kv_heads + h, ki, 0)),
                # lane-dense RoPE tables for the q tile and kv tile
                pl.BlockSpec((tq, hd), lambda h, qi, ki: (qi, 0)),
                pl.BlockSpec((tq, hd), lambda h, qi, ki: (qi, 0)),
                pl.BlockSpec((tkv, hd), lambda h, qi, ki: (ki, 0)),
                pl.BlockSpec((tkv, hd), lambda h, qi, ki: (ki, 0)),
            ],
            out_specs=pl.BlockSpec((group, tq, hd), lambda h, qi, ki: (h, qi, 0)),
            scratch_shapes=[
                pltpu.VMEM((group * tq, hd), jnp.bfloat16),   # rotated, scaled q
                pltpu.VMEM((group * tq, 1), jnp.float32),     # running max
                pltpu.VMEM((group * tq, 1), jnp.float32),     # running sum
                pltpu.VMEM((group * tq, hd), jnp.float32),    # output accumulator
            ],
        ),
        compiler_params=pltpu.CompilerParams(
            dimension_semantics=("parallel", "parallel", "arbitrary"),
            vmem_limit_bytes=VMEM_LIMIT_BYTES,
        ),
        cost_estimate=pl.CostEstimate(flops=flops,
                                      transcendentals=num_heads * S * S,
                                      bytes_accessed=bytes_accessed),
    )(qkv_hm, qkv_hm, qkv_hm, cos, sin, cos, sin)


# ---------------------------------------------------------------------------
# Kernel 3: output projection, reducing over heads.
# ---------------------------------------------------------------------------
def _o_proj_kernel(a_ref, w_ref, o_ref, acc_ref):
    @pl.when(pl.program_id(2) == 0)
    def _init():
        acc_ref[...] = jnp.zeros_like(acc_ref)

    acc_ref[...] += jnp.dot(a_ref[0], w_ref[0],
                            preferred_element_type=jnp.float32)

    @pl.when(pl.program_id(2) == pl.num_programs(2) - 1)
    def _store():
        o_ref[...] = acc_ref[...].astype(o_ref.dtype)


def o_projection(attn_hm, w_o_hm, *, m_block, n_block, out_dtype):
    nh, S, hd = attn_hm.shape
    nh2, hd2, N = w_o_hm.shape
    assert nh == nh2 and hd == hd2
    tm = _pick_tile(S, m_block, 8)
    tn = _pick_tile(N, n_block, 128)
    grid = (S // tm, N // tn, nh)
    flops = 2 * S * nh * hd * N
    bytes_accessed = (nh * S * hd + nh * hd * N) * 2 + S * N * 4
    return pl.pallas_call(
        _o_proj_kernel,
        out_shape=jax.ShapeDtypeStruct((S, N), out_dtype),
        grid_spec=pltpu.PrefetchScalarGridSpec(
            num_scalar_prefetch=0,
            grid=grid,
            in_specs=[
                pl.BlockSpec((1, tm, hd), lambda i, j, h: (h, i, 0)),
                pl.BlockSpec((1, hd, tn), lambda i, j, h: (h, 0, j)),
            ],
            out_specs=pl.BlockSpec((tm, tn), lambda i, j, h: (i, j)),
            scratch_shapes=[pltpu.VMEM((tm, tn), jnp.float32)],
        ),
        compiler_params=pltpu.CompilerParams(
            dimension_semantics=("parallel", "parallel", "arbitrary"),
            vmem_limit_bytes=VMEM_LIMIT_BYTES,
        ),
        cost_estimate=pl.CostEstimate(flops=flops, transcendentals=0,
                                      bytes_accessed=bytes_accessed),
    )(attn_hm, w_o_hm)


# ---------------------------------------------------------------------------
# XverseAttention forward (JAX glue around the Pallas kernels)
# ---------------------------------------------------------------------------
class XverseAttentionPallas:
    """Pallas-TPU forward of XverseAttention (single device, tp_size == 1)."""

    def __init__(self, hidden_size, num_heads, num_kv_heads,
                 rope_theta=10000.0,
                 q_block=256, kv_block=256,
                 proj_m_block=256, proj_k_block=512, out_n_block=256,
                 key=jax.random.PRNGKey(0)):
        assert hidden_size % num_heads == 0
        assert num_heads % num_kv_heads == 0
        self.hidden_size = hidden_size
        self.num_heads = num_heads
        self.num_kv_heads = num_kv_heads
        self.head_dim = hidden_size // num_heads
        self.q_size = num_heads * self.head_dim
        self.kv_size = num_kv_heads * self.head_dim
        self.scaling = self.head_dim ** -0.5
        self.rope_theta = rope_theta
        self.q_block = q_block
        self.kv_block = kv_block
        self.proj_m_block = proj_m_block
        self.proj_k_block = proj_k_block
        self.out_n_block = out_n_block

        H = num_heads + 2 * num_kv_heads
        k1, k2 = jax.random.split(key)
        # Head-major weights: w_qkv_hm[h] is the [hidden, head_dim] slice of
        # W_qkv^T for head h (q heads first, then k heads, then v heads).
        self.w_qkv_hm = (
            jax.random.normal(k1, (H, hidden_size, self.head_dim), jnp.float32)
            * 0.02
        ).astype(jnp.bfloat16)
        self.w_o_hm = (
            jax.random.normal(k2, (num_heads, self.head_dim, hidden_size),
                              jnp.float32) * 0.02
        ).astype(jnp.bfloat16)

    def _rope_tables(self, positions):
        hd = self.head_dim
        inv_freq = 1.0 / (
            self.rope_theta
            ** (jnp.arange(0, hd, 2, dtype=jnp.float32) / hd))
        freqs = positions.astype(jnp.float32)[:, None] * inv_freq[None, :]
        cos = jnp.cos(freqs)
        sin = jnp.sin(freqs)
        # Lane-dense [S, head_dim] tables (halves duplicated) for full-width
        # vector ops inside the attention kernel.
        return (jnp.concatenate([cos, cos], axis=-1),
                jnp.concatenate([sin, sin], axis=-1))

    def __call__(self, positions, hidden_states):
        out_dtype = hidden_states.dtype
        x = hidden_states.astype(jnp.bfloat16)
        cos, sin = self._rope_tables(positions)

        # QKV projection straight into head-major [H, S, head_dim] layout.
        qkv_hm = head_major_projection(
            x, self.w_qkv_hm,
            m_block=self.proj_m_block, k_block=self.proj_k_block)

        # Flash attention with fused RoPE, causal tile skipping and GQA reuse.
        attn_hm = flash_attention(
            qkv_hm, cos, sin, self.num_heads, self.num_kv_heads, self.scaling,
            q_block=self.q_block, kv_block=self.kv_block)

        # Output projection reducing over heads.
        return o_projection(
            attn_hm, self.w_o_hm,
            m_block=self.proj_m_block, n_block=self.out_n_block,
            out_dtype=out_dtype)


# ---------------------------------------------------------------------------
# Pure-JAX reference (same math, f32) for a correctness check
# ---------------------------------------------------------------------------
def reference_forward(mod, positions, hidden_states):
    nh, nkv, hd = mod.num_heads, mod.num_kv_heads, mod.head_dim
    S = hidden_states.shape[0]
    x = hidden_states.astype(jnp.float32)
    w_qkv = mod.w_qkv_hm.astype(jnp.float32)            # [H, hidden, hd]
    qkv = jnp.einsum("sk,hkd->hsd", x, w_qkv)
    q, k, v = qkv[:nh], qkv[nh:nh + nkv], qkv[nh + nkv:]

    cos, sin = mod._rope_tables(positions)              # [S, hd]

    def rope(t):
        half = hd // 2
        rot = jnp.concatenate([-t[..., half:], t[..., :half]], axis=-1)
        return t * cos[None] + rot * sin[None]

    q = rope(q)
    k = rope(k)
    group = nh // nkv
    k = jnp.repeat(k, group, axis=0)
    v = jnp.repeat(v, group, axis=0)
    s = jnp.einsum("hqd,hkd->hqk", q, k) * mod.scaling
    mask = jnp.tril(jnp.ones((S, S), dtype=bool))
    s = jnp.where(mask[None], s, NEG_INF)
    p = jax.nn.softmax(s, axis=-1)
    o = jnp.einsum("hqk,hkd->hqd", p, v)
    w_o = mod.w_o_hm.astype(jnp.float32)                # [nh, hd, hidden]
    return jnp.einsum("hsd,hdn->sn", o, w_o)


if __name__ == "__main__":
    hidden_size = 256
    num_heads = 4
    num_kv_heads = 2
    seq_len = 64

    key = jax.random.PRNGKey(0)
    k_param, k_x = jax.random.split(key)

    # Small blocks so the test exercises multi-tile grids, the K-axis
    # accumulators, the online-softmax update and the causal tile-skip path.
    mod = XverseAttentionPallas(
        hidden_size, num_heads, num_kv_heads,
        q_block=32, kv_block=32,
        proj_m_block=32, proj_k_block=128, out_n_block=128,
        key=k_param)

    hidden_states = jax.random.normal(k_x, (seq_len, hidden_size), jnp.float32)
    positions = jnp.arange(seq_len, dtype=jnp.int32)

    out = mod(positions, hidden_states)
    jax.block_until_ready(out)

    ref = reference_forward(mod, positions, hidden_states)
    np.testing.assert_allclose(np.asarray(out, dtype=np.float32),
                               np.asarray(ref), atol=3e-2, rtol=3e-2)

    print("KERNEL_OK")
</pallas_src>

<mosaic_0001>
module attributes {stable_mosaic.version = 11 : i64} {
  func.func @_head_proj_kernel(%arg0: i32, %arg1: i32, %arg2: i32, %arg3: memref<32x128xbf16, #tpu.memory_space<vmem>>, %arg4: memref<1x128x64xbf16, #tpu.memory_space<vmem>>, %arg5: memref<1x32x64xbf16, #tpu.memory_space<vmem>>, %arg6: memref<32x64xf32, #tpu.memory_space<vmem>>) attributes {dimension_semantics = [#tpu.dimension_semantics<parallel>, #tpu.dimension_semantics<parallel>, #tpu.dimension_semantics<arbitrary>], iteration_bounds = array<i64: 8, 2, 2>, scalar_prefetch = 0 : i64, scratch_operands = 1 : i64, tpu.core_type = #tpu.core_type<tc>, window_params = [{transform_indices = @transform_0, window_bounds = array<i64: 32, 128>}, {transform_indices = @transform_1, window_bounds = array<i64: 1, 128, 64>}, {transform_indices = @transform_2, window_bounds = array<i64: 1, 32, 64>}]} {
    %c0_i32 = arith.constant 0 : i32
    %0 = arith.cmpi eq, %arg2, %c0_i32 : i32
    %1 = arith.extui %0 : i1 to i32
    %c0_i32_0 = arith.constant 0 : i32
    %2 = arith.cmpi ne, %1, %c0_i32_0 : i32
    scf.if %2 {
      %cst_10 = arith.constant 0.000000e+00 : f32
      %13 = vector.broadcast %cst_10 : f32 to vector<32x64xf32>
      %c0_11 = arith.constant 0 : index
      %c0_12 = arith.constant 0 : index
      %14 = vector.load %arg6[%c0_11, %c0_12] : memref<32x64xf32, #tpu.memory_space<vmem>>, vector<32x64xf32>
      tpu.vector_store %arg6[%c0_11, %c0_12], %13 {strides = array<i32>} : memref<32x64xf32, #tpu.memory_space<vmem>>, vector<32x64xf32>,
    } else {
    }
    %c0 = arith.constant 0 : index
    %c0_1 = arith.constant 0 : index
    %3 = vector.load %arg6[%c0, %c0_1] : memref<32x64xf32, #tpu.memory_space<vmem>>, vector<32x64xf32>
    %c0_2 = arith.constant 0 : index
    %c0_3 = arith.constant 0 : index
    %4 = vector.load %arg3[%c0_2, %c0_3] : memref<32x128xbf16, #tpu.memory_space<vmem>>, vector<32x128xbf16>
    %c0_4 = arith.constant 0 : index
    %c0_5 = arith.constant 0 : index
    %c0_6 = arith.constant 0 : index
    %5 = vector.load %arg4[%c0_4, %c0_5, %c0_6] : memref<1x128x64xbf16, #tpu.memory_space<vmem>>, vector<1x128x64xbf16>
    %6 = vector.shape_cast %5 : vector<1x128x64xbf16> to vector<128x64xbf16>
    %cst = arith.constant dense<0.000000e+00> : vector<32x64xf32>
    %7 = tpu.matmul %4, %6, %cst {dimension_numbers = #tpu.dot_dimension_numbers<[1], [0], [0], [1], [0, 0, 1, 1], [], []>} : vector<32x128xbf16>, vector<128x64xbf16>, vector<32x64xf32> -> vector<32x64xf32>
    %8 = arith.addf %3, %7 : vector<32x64xf32>
    %c0_7 = arith.constant 0 : index
    %c0_8 = arith.constant 0 : index
    %9 = vector.load %arg6[%c0_7, %c0_8] : memref<32x64xf32, #tpu.memory_space<vmem>>, vector<32x64xf32>
    tpu.vector_store %arg6[%c0_7, %c0_8], %8 {strides = array<i32>} : memref<32x64xf32, #tpu.memory_space<vmem>>, vector<32x64xf32>,
    %c1_i32 = arith.constant 1 : i32
    %10 = arith.cmpi eq, %arg2, %c1_i32 : i32
    %11 = arith.extui %10 : i1 to i32
    %c0_i32_9 = arith.constant 0 : i32
    %12 = arith.cmpi ne, %11, %c0_i32_9 : i32
    scf.if %12 {
      %c0_10 = arith.constant 0 : index
      %c0_11 = arith.constant 0 : index
      %13 = vector.load %arg6[%c0_10, %c0_11] : memref<32x64xf32, #tpu.memory_space<vmem>>, vector<32x64xf32>
      %14 = arith.truncf %13 : vector<32x64xf32> to vector<32x64xbf16>
      %c0_12 = arith.constant 0 : index
      %c0_13 = arith.constant 0 : index
      %c0_14 = arith.constant 0 : index
      %15 = vector.load %arg5[%c0_12, %c0_13, %c0_14] : memref<1x32x64xbf16, #tpu.memory_space<vmem>>, vector<1x32x64xbf16>
      %16 = vector.shape_cast %15 : vector<1x32x64xbf16> to vector<32x64xbf16>
      %17 = vector.shape_cast %14 : vector<32x64xbf16> to vector<1x32x64xbf16>
      tpu.vector_store %arg5[%c0_12, %c0_13, %c0_14], %17 {strides = array<i32>} : memref<1x32x64xbf16, #tpu.memory_space<vmem>>, vector<1x32x64xbf16>,
    } else {
    }
    return
  }
  func.func @transform_0(%arg0: i32, %arg1: i32, %arg2: i32) -> (i32, i32) {
    %c0_i32 = arith.constant 0 : i32
    return %arg1, %arg2 : i32, i32
  }
  func.func @transform_1(%arg0: i32, %arg1: i32, %arg2: i32) -> (i32, i32, i32) {
    %c0_i32 = arith.constant 0 : i32
    %c0_i32_0 = arith.constant 0 : i32
    return %arg0, %arg2, %c0_i32 : i32, i32, i32
  }
  func.func @transform_2(%arg0: i32, %arg1: i32, %arg2: i32) -> (i32, i32, i32) {
    %c0_i32 = arith.constant 0 : i32
    %c0_i32_0 = arith.constant 0 : i32
    return %arg0, %arg1, %c0_i32 : i32, i32, i32
  }
}

</mosaic_0001>

<bundles_post_ra>
// kernel: tpu_custom_call.1
= control target key start
LH: loop header
LB: loop body
LE: loop exit
PB: predicated region body
PF: predicated region fallthrough
CT: control target
= control target key end

     0   :  { %s1126_s0 = inlined_call_operand.vmem [shape: bf16[64,256], index: 0, kind: input, shape index: {}]   ;;  %s1127_s1 = inlined_call_operand.vmem [shape: bf16[8,256,64], index: 1, kind: input, shape index: {}]   ;;  %s1128_s2 = inlined_call_operand.hbm [shape: bf16[8,64,64], index: 2, kind: output, shape index: {}]  }
   0x1   :  { %1132 = sst [smem:[#allocation10_spill]] %s1126_s0 }
   0x2   :  { %7 = vsyncpa [#allocation5], 0 }
   0x3   :  { %9 = vsyncpa [#allocation5 + $0x1], 0  ;;  %s898_s9 = smov 0   ;;  %s900_s10 = smov 0  }
   0x4   :  { %s902_s11 = smov 0   ;;  %s904_s12 = smov 0  }
   0x5   :  { %s906_s13 = smov 0   ;;  %s908_s14 = smov 0  }
   0x6   :  { %s910_s15 = smov 0   ;;  %s912_s16 = smov 0  }
   0x7   :  { %s914_s17 = smov 0   ;;  %s916_s18 = smov 0  }
   0x8   :  { %s918_s19 = smov 0   ;;  %s920_s20 = smov 0  }
   0x9 LB: > { %s564_s21 = sadd.s32 4294967295, %s877_s20   ;;  %s565_s22 = sadd.s32 4294967294, %s877_s20   ;;  %s877_s20 = sphi %s920_s20, %s15_s20   ;;  %s873_s19 = sphi %s918_s19, %s1153_s19   ;;  %s869_s18 = sphi %s916_s18, %s1152_s18   ;;  %s865_s17 = sphi %s914_s17, %s1151_s17   ;;  %s861_s16 = sphi %s912_s16, %s1150_s16   ;;  %s857_s15 = sphi %s910_s15, %s1149_s15   ;;  %s853_s14 = sphi %s908_s14, %s1148_s14   ;;  %s849_s13 = sphi %s906_s13, %s1147_s13   ;;  %s845_s12 = sphi %s904_s12, %s1146_s12   ;;  %s841_s11 = sphi %s902_s11, %s1145_s11   ;;  %s837_s10 = sphi %s900_s10, %s1144_s10   ;;  %s833_s9 = sphi %s898_s9, %s1143_s9  }
   0xa   : > { %s27_s23 = sadd.s32 1, %s865_s17  ;;  %s30_s24 = sadd.s32 1, %s869_s18 }
   0xb   : > { %p28_p0 = scmp.ge.s32.totalorder %s27_s23, 2  ;;  %s34_s25 = sadd.s32 1, %s873_s19 }
   0xc   : > { %s43_s26 = sadd.s32 1, %s849_s13  ;;  %p50_p1 = scmp.ne.s32.totalorder %s849_s13, %s845_s12 }
   0xd   : > { %s1155_s23 = smov (%p28_p0, %s27_s23), 0  ;;  %s1157_s24 = smov (!%p28_p0, %s30_s24), %s869_s18 }
   0xe   : > { %1133 = sst [smem:[#allocation7_spill]] %s1155_s23  ;;  %s39_s27 = ssub.s32 %s865_s17, %s1155_s23 }
   0xf   : > { %p51_p2 = scmp.eq.s32.totalorder %s877_s20, 0  ;;  %p32_p3 = scmp.ge.s32.totalorder %s1157_s24, 2 }
  0x10   : > { %s99_s28 = sadd.s32 1, %s841_s11  ;;  %p109_p5 = scmp.ne.s32.totalorder %s841_s11, %s837_s10 }
  0x11   : > { %p973_p4 = por %p51_p2, %p50_p1  ;;  %s1159_s24 = smov (%p32_p3, %s1157_s24), 0 }
  0x12   : > { %1135 = sst [smem:[#allocation8_spill]] %s1159_s24  ;;  %s1161_s25 = smov (!%p32_p3, %s34_s25), %s873_s19 }
  0x13   : > { %s38_s30 = ssub.s32 %s869_s18, %s1159_s24  ;;  %p110_p6 = scmp.eq.s32.totalorder %s564_s21, 31 }
  0x14   : > { %p36_p7 = scmp.ge.s32.totalorder %s1161_s25, 8  ;;  %s40_s3 = sor.u32 %s39_s27, %s38_s30 }
  0x15   : > { %p41_p8 = scmp.eq.s32.totalorder %s40_s3, 0  ;;  %p984_p9 = por %p110_p6, %p109_p5 }
  0x16   : > { %s1163_s25 = smov (%p36_p7, %s1161_s25), 0  ;;  %p115_p10 = scmp.ne.s32.totalorder %s837_s10, %s833_s9 }
  0x17   : > { %1137 = sst [smem:[#allocation9_spill]] %s1163_s25  ;;  %s94_s6 = ssub.s32 %s873_s19, %s1163_s25 }
  0x18   : > { %s991_s5 = scalar_select %p41_p8, %s849_s13, %s43_s26  }
  0x19   : > { %s96_s7 = sor.u32 %s94_s6, %s38_s30  ;;  %p116_p11 = scmp.eq.s32.totalorder %s565_s22, 31 }
  0x1a   : > { %p97_p12 = scmp.eq.s32.totalorder %s96_s7, 0  ;;  %p567_p0 = scmp.ge.s32.totalorder %s877_s20, 32 }
  0x1b   : > { %p997_p13 = por %p116_p11, %p115_p10 }
  0x1c   : > { %s1002_s21 = scalar_select %p97_p12, %s841_s11, %s99_s28  }
  0x1d   : > { %132 = sbr.rel (%p567_p0) target bundleno = 48 (0x30), region = 16 }
  0x24   : > { %135 = sbr.rel (!%p973_p4) target bundleno = 48 (0x30), region = 20  ;;  %s137_s26 = sand.u32 (%p973_p4), 1, %s849_s13  }
  0x25   : > { %s600_s27 = sshll.u32 (%p973_p4), %s869_s18, 3  ;;  %s568_s30 = sshll.u32 (%p973_p4), %s137_s26, 4 }
  0x26   : > { %s142_s22 = sadd.s32 (%p973_p4), %s865_s17, %s600_s27  ;;  %s1139_s0 = sld [smem:[#allocation10_spill]] (%p973_p4) }
  0x27   : > { %s571_s3 = sshll.u32 (%p973_p4), %s142_s22, 2  ;;  %s139_s28 = scalar_lea.vmem (%p973_p4), [#allocation3], %s568_s30 }
  0x2c   : > { %s144_s25 = scalar_lea.vmem %s1139_s0, %s571_s3 }
  0x2d   : > { %v160_v0 = vld [vmem:[%s144_s25] sm:$0xf]  ;;  %v162_v1 = vld [vmem:[%s144_s25 + $0x8] sm:$0xf]  ;;  %v164_v2 = vld [vmem:[%s144_s25 + $0x10] sm:$0xf] }
  0x2e   : > { %161 = vst [vmem:[%s139_s28] sm:$0xf] %v160_v0  ;;  %163 = vst [vmem:[%s139_s28 + $0x4] sm:$0xf] %v162_v1  ;;  %v166_v3 = vld [vmem:[%s144_s25 + $0x18] sm:$0xf] }
  0x2f   : > { %165 = vst [vmem:[%s139_s28 + $0x8] sm:$0xf] %v164_v2  ;;  %167 = vst [vmem:[%s139_s28 + $0xc] sm:$0xf] %v166_v3 }
  0x30 PF: > { %p572_p1 = scmp.ge.s32.totalorder %s877_s20, 1  ;;  %p210_p2 = scmp.lt.s32.totalorder %s877_s20, 33 }
  0x32   : > { %p211_p3 = pnand %p572_p1, %p210_p2 }
  0x33   : > { %s217_s29 = sand.u32 (!%p211_p3), 1, %s845_s12   ;;  %s244_s26 = sand.u32 (!%p211_p3), 1, %s837_s10  }
  0x34   : > { %214 = sbr.rel (%p211_p3) target bundleno = 355 (0x163), region = 65  ;;  %s1017_s27 = sshll.u32 (!%p211_p3), %s217_s29, 4 }
  0x35   : > { %s574_s25 = sshll.u32 (!%p211_p3), %s244_s26, 4  ;;  %s575_s30 = sshll.u32 (!%p211_p3), %s853_s14, 4 }
  0x36   : > { %p249_p4 = scmp.lt.s32.totalorder (!%p211_p3), %s861_s16, 7  ;;  %p251_p5 = scmp.lt.s32.totalorder (!%p211_p3), %s575_s30, 31 }
  0x37   : > { %s219_s12 = scalar_lea.vmem (!%p211_p3), [#allocation3], %s1017_s27  ;;  %s1030_s23 = scalar_lea.vmem (!%p211_p3), [#allocation4], %s574_s25 }
  0x38   : > { %p578_p6 = scmp.ne.s32.totalorder (!%p211_p3), %s853_s14, 0 }
  0x3b   : > { %s250_s22 = scalar_select %p249_p4, %s861_s16, 7 }
  0x3c   : > { %s1165_s30 = smov (!%p251_p5, %s575_s30), 31  ;;  %263 = sbr.rel (%p578_p6) target bundleno = 67 (0x43), region = 73 }
  0x3d   : > { %s576_s3 = sshll.u32 %s250_s22, 5  ;;  %vm264_vm0 = vcmask (!%p578_p6), 523264   ;;  %v879_v4 = vmov (!%p578_p6), 0.0  }
  0x3e   : > { %s254_s6 = sadd.s32 %s576_s3, %s1165_s30  ;;  %265 = vst.msk [vmem:[#allocation2] sm:$0xff] (!%p578_p6), %vm264_vm0, %v879_v4  ;;  %266 = vst.msk [vmem:[#allocation2 + $0x8] sm:$0xff] (!%p578_p6), %vm264_vm0, %v879_v4 }
  0x3f   : > { %s577_s7 = sshll.u32 %s254_s6, 2  ;;  %267 = vst.msk [vmem:[#allocation2 + $0x10] sm:$0xff] (!%p578_p6), %vm264_vm0, %v879_v4  ;;  %268 = vst.msk [vmem:[#allocation2 + $0x18] sm:$0xff] (!%p578_p6), %vm264_vm0, %v879_v4 }
  0x40   : > { %s1027_s24 = scalar_lea.vmem %s1127_s1, %s577_s7 }
  0x43 PF: > { %v741_v5 = vld [vmem:[%s1027_s24] sm:$0xff]   ;;  %v742_v6 = vld [vmem:[%s1027_s24 + $0x8] sm:$0xff]   ;;  %v743_v7 = vld [vmem:[%s1027_s24 + $0x10] sm:$0xff]   ;;  %vm406_vm1 = vcmask 523264   ;;  %p589_p7 = scmp.ne.s32.totalorder %s853_s14, 1 }
  0x44   : > { %615 = vmatprep.subr.bf16.mxu0 %v741_v5  ;;  %v744_v8 = vld [vmem:[%s1027_s24 + $0x18] sm:$0xff]   ;;  %v749_v9 = vld [vmem:[%s219_s12] sm:$0xff]   ;;  %v746_v11 = vld [vmem:[%s1027_s24 + $0x28] sm:$0xff]   ;;  %vm435_vm2 = vcmask (!%p589_p7), 519168  }
  0x45   : > { %616 = vmatpush3.bf16.msra.mxu0 %v741_v5  ;;  %631 = vmatprep.mubr.bf16.mxu0 %v749_v9  ;;  %v745_v10 = vld [vmem:[%s1027_s24 + $0x20] sm:$0xff]   ;;  %v747_v12 = vld [vmem:[%s1027_s24 + $0x30] sm:$0xff]   ;;  %v748_v13 = vld [vmem:[%s1027_s24 + $0x38] sm:$0xff]  }
  0x46   : > { %617 = vmatprep.subr.bf16.mxu0 %v742_v6  ;;  %v750_v14 = vld [vmem:[%s219_s12 + $0x8] sm:$0xff]   ;;  %v271_v15 = vld [vmem:[#allocation2 + $0x10] sm:$0xff]  ;;  %v269_v16 = vld [vmem:[#allocation2] sm:$0xff] }
  0x47   : > { %v272_v18 = vld [vmem:[#allocation2 + $0x18] sm:$0xff]  ;;  %v270_v21 = vld [vmem:[#allocation2 + $0x8] sm:$0xff] }
  0x49   : > { %618 = vmatpush3.bf16.msra.mxu0 %v742_v6 }
  0x4a   : > { %619 = vmatprep.subr.bf16.mxu0 %v743_v7 }
  0x4d   : > { %620 = vmatpush3.bf16.msra.mxu0 %v743_v7 }
  0x4e   : > { %621 = vmatprep.subr.bf16.mxu0 %v744_v8 }
  0x51   : > { %622 = vmatpush3.bf16.msra.mxu0 %v744_v8 }
  0x52   : > { %623 = vmatprep.subr.bf16.mxu0 %v745_v10 }
  0x55   : > { %624 = vmatpush3.bf16.msra.mxu0 %v745_v10 }
  0x56   : > { %625 = vmatprep.subr.bf16.mxu0 %v746_v11 }
  0x59   : > { %626 = vmatpush3.bf16.msra.mxu0 %v746_v11 }
  0x5a   : > { %627 = vmatprep.subr.bf16.mxu0 %v747_v12 }
  0x5d   : > { %628 = vmatpush3.bf16.msra.mxu0 %v747_v12 }
  0x5e   : > { %629 = vmatprep.subr.bf16.mxu0 %v748_v13 }
  0x61   : > { %630 = vmatpush3.bf16.msra.mxu0 %v748_v13 }
  0x64   : > { %632 = vmatmul.mubr.bf16.vlgmr.msra.gmra.mrb[0].mxu0 %v750_v14 }
 0x137   : > { %v633_v17 = vpop.f32.mrb[0].mxu0  ;;  %414 = sbr.rel (%p589_p7) target bundleno = 328 (0x148), region = 77 }
 0x138   : > { %v404_v19 = vadd.f32 %v633_v17, %v271_v15  ;;  %v387_v20 = vpop.f32.mrb[1].mxu0 }
 0x139   : > { %v402_v22 = vadd.f32 %v387_v20, %v269_v16  ;;  %v634_v23 = vpop.f32.mrb[2].mxu0 }
 0x13a   : > { %409 = vst.msk [vmem:[#allocation2 + $0x10] sm:$0xff] %vm406_vm1, %v404_v19  ;;  %v405_v24 = vadd.f32 %v634_v23, %v272_v18  ;;  %v390_v25 = vpop.f32.mrb[3].mxu0 }
 0x13b   : > { %407 = vst.msk [vmem:[#allocation2] sm:$0xff] %vm406_vm1, %v402_v22  ;;  %v403_v26 = vadd.f32 %v390_v25, %v270_v21 }
 0x13c   : > { %410 = vst.msk [vmem:[#allocation2 + $0x18] sm:$0xff] %vm406_vm1, %v405_v24 }
 0x13d   : > { %408 = vst.msk [vmem:[#allocation2 + $0x8] sm:$0xff] %vm406_vm1, %v403_v26 }
 0x141   : > { %v417_v29 = vld [vmem:[#allocation2 + $0x10] sm:$0xff] }
 0x142   : > { %v415_v27 = vld [vmem:[#allocation2] sm:$0xff]  ;;  %v603_v32 = vpack.c.bf16 %v417_v29, %v417_v29 }
 0x143   : > { %v601_v30 = vpack.c.bf16 %v415_v27, %v415_v27  ;;  %v418_v33 = vld [vmem:[#allocation2 + $0x18] sm:$0xff] }
 0x144   : > { %v416_v28 = vld [vmem:[#allocation2 + $0x8] sm:$0xff]  ;;  %v604_v34 = vpack.c.bf16 %v418_v33, %v418_v33  ;;  %438 = vst.msk [vmem:[%s1030_s23 + $0x8] sm:$0xf] %vm435_vm2, %v603_v32 }
 0x145   : > { %v602_v31 = vpack.c.bf16 %v416_v28, %v416_v28  ;;  %436 = vst.msk [vmem:[%s1030_s23] sm:$0xf] %vm435_vm2, %v601_v30 }
 0x146   : > { %439 = vst.msk [vmem:[%s1030_s23 + $0xc] sm:$0xf] %vm435_vm2, %v604_v34 }
 0x147   : > { %437 = vst.msk [vmem:[%s1030_s23 + $0x4] sm:$0xf] %vm435_vm2, %v602_v31 }
 0x148 PF: > { %s595_s0 = sshll.u32 %s857_s15, 2  ;;  %s596_s14 = sshll.u32 %s861_s16, 3 }
 0x149   : > { %s456_s24 = sshll.u32 %s1030_s23, 4  ;;  %s453_s29 = sadd.s32 %s596_s14, %s595_s0  ;;  %s1053_s24 = int_to_ptr.vmem [resolvable:$true] %s456_s24 }
 0x14a   : > { %s597_s27 = sshll.u32 %s453_s29, 6  ;;  %s1062_s3 = scalar_lea.sflag [#allocation5], %s244_s26 }
 0x14b   : > { %s1058_s22 = scalar_lea.hbm %s1128_s2, %s597_s27  ;;  %s751_s6 = scalar_lea.vmem %s1053_s24, 256 }
 0x14c   : > { %p752_p8 = scmp.ne.s32.totalorder %s1053_s24, %s751_s6  ;;  %s880_s15 = smov [#allocation4]  }
 0x14d   : > { %s755_s16 = sshll.u32 %s880_s15, 4  ;;  %s756_s16 = int_to_ptr.vmem [resolvable:$false] %s755_s16 }
 0x14e   : > { %p753_p10 = pnand %p752_p8, %p984_p9  ;;  %s757_s23 = scalar_lea.vmem %s756_s16, 512 }
 0x14f   : > { %p758_p12 = scmp.lt.s32.totalorder %s1053_s24, %s756_s16  ;;  %p759_p0 = scmp.lt.s32.totalorder %s757_s23, %s751_s6 }
 0x150   : > { %p754_p11 = pneg %p753_p10 }
 0x151   : > { %p760_p1 = por %p759_p0, %p758_p12 }
 0x153   : > { %p761_p2 = pnand %p760_p1, %p754_p11 }
 0x155   : > { %764 = shalt.err (!%p761_p2)
}
 0x156   : > { %s765_s26 = scalar_lea.hbm %s1058_s22, 256  ;;  %s769_s12 = scalar_lea.hbm %s1128_s2, 4096 }
 0x157   : > { %p766_p3 = scmp.ne.s32.totalorder %s1058_s22, %s765_s26  ;;  %p770_p6 = scmp.lt.u32.totalorder %s1058_s22, %s1128_s2 }
 0x158   : > { %p771_p7 = scmp.lt.u32.totalorder %s769_s12, %s765_s26  ;;  %p773_p10 = scmp.lt.u32.totalorder %s765_s26, %s1058_s22 }
 0x159   : > { %p767_p4 = pnand %p766_p3, %p984_p9 }
 0x15a   : > { %p772_p8 = por %p771_p7, %p770_p6 }
 0x15b   : > { %p768_p5 = pneg %p767_p4 }
 0x15c   : > { %p774_p11 = por %p773_p10, %p772_p8 }
 0x15e   : > { %p775_p12 = pnand %p774_p11, %p768_p5 }
 0x160   : > { %778 = shalt.err (!%p775_p12)
}
 0x161   : > { %s881_s29 = smov 64   ;;  %s882_s27 = smov 4  }
 0x162   : > { %635 = dma.vmem_to_hbm [thread:$0]  (%p984_p9), %s1053_s24, 256, %s1058_s22, %s1062_s3, %s881_s29, %s881_s29, %s882_s27  }
 0x163 PF: > { %p641_p0 = scmp.ge.s32.totalorder %s877_s20, 2  ;;  %s471_s25 = sand.u32 1, %s833_s9  }
 0x164   : > { %s472_s30 = scalar_lea.sflag [#allocation5], %s471_s25 }
 0x165   : > { %p638_p1 = pnand %p641_p0, %p997_p13 }
 0x167   : > { %828 = dma.done.wait (!%p638_p1), %s472_s30, 256  }
 0x168   : > { %830 = vsyncadd (!%p638_p1), %s472_s30, 4294967040  ;;  %s15_s20 = sadd.s32 1, %s877_s20   ;;  %s1140_s4 = sld [smem:[#allocation7_spill]] }
 0x169   : > { %p12_p2 = scmp.ge.s32.totalorder %s15_s20, 34   ;;  %s1141_s24 = sld [smem:[#allocation8_spill]] }
 0x16a   : > { %s1142_s22 = sld [smem:[#allocation9_spill]]  ;;  %s1143_s9 = smov %s837_s10 }
 0x16b   : > { %s1144_s10 = smov %s841_s11  ;;  %s1145_s11 = smov %s1002_s21 }
 0x16c   : > { %s1146_s12 = smov %s849_s13  ;;  %s1147_s13 = smov %s991_s5 }
 0x16d   : > { %s1148_s14 = smov %s865_s17  ;;  %s1149_s15 = smov %s869_s18 }
 0x16e   : > { %s1150_s16 = smov %s873_s19  ;;  %s1151_s17 = smov %s1140_s4 }
 0x16f   : > { %s1152_s18 = smov %s1141_s24  ;;  %14 = sbr.rel (!%p12_p2) target bundleno = 9 (0x9), region = 120 }
 0x170   : > { %s1153_s19 = smov %s1142_s22 }
 0x176   :  { %477 = vsyncpa [#allocation5], 1 }
 0x177   :  { %479 = vsyncpa [#allocation5 + $0x1], 1 }

</bundles_post_ra>
